<compile_context>
chip_gen: v7x
topology: tpu7x:2x2x1
jax: 0.10.0
libtpu: 0.0.40
codegen_flags: <defaults>
</compile_context>

<pallas_src>
import functools
import math

import jax
import jax.numpy as jnp
from jax import lax
from jax.experimental import pallas as pl
from jax.experimental.pallas import tpu as pltpu

_LANE = 128
_DEFAULT_VMEM_CAP = 64 * 1024 * 1024       # smallest per-TC VMEM (v7x) if query fails
_TARGET_TILE_BYTES = 2 * 1024 * 1024        # ~2 MiB of real input bytes per grid step
_MIN_SPLIT_BYTES = 256 * 1024               # force >=2 grid steps above this size


def _vmem_budget():
    """Generation-aware scoped-VMEM limit and per-step working-set budget."""
    cap = _DEFAULT_VMEM_CAP
    try:
        info = pltpu.get_tpu_info()
        cap = int(getattr(info, "vmem_capacity_bytes", cap)) or cap
    except Exception:  # no TPU visible at import time -> conservative default
        pass
    return cap // 2, cap // 8


_VMEM_LIMIT_BYTES, _TILE_BUDGET_BYTES = _vmem_budget()


def _cdiv(a, b):
    return -(-a // b)


def _round_down(x, m):
    return (x // m) * m


def _round_up(x, m):
    return ((x + m - 1) // m) * m


def _sublane_unit(dtype):
    # Sublane multiple: 8 for 4-byte, 16 for 2-byte, 32 for 1-byte dtypes.
    itemsize = jnp.dtype(dtype).itemsize
    return max(8, 32 // max(1, itemsize))


def _bytes_per_elem_working_set(dtype):
    # in + out tiles (double-buffered) + ~3 f32 intermediates (x32, exp, prod).
    itemsize = jnp.dtype(dtype).itemsize
    return 4 * itemsize + 3 * 4


def _precise_reciprocal(s):
    """EUP reciprocal estimate + 2 Newton steps (full f32 accuracy).

    Only ever applied to the reduced (one-per-row) array, so the refinement is
    essentially free; the per-element divide becomes a cheap VPU multiply.
    """
    r = pl.reciprocal(s, approx=True)
    r = r * (2.0 - s * r)
    r = r * (2.0 - s * r)
    return r


def _cost_estimate(n_elem, itemsize):
    return pl.CostEstimate(
        flops=5 * n_elem,
        transcendentals=n_elem,
        bytes_accessed=2 * n_elem * itemsize,
    )


# --------------------------------------------------------------------------
# Kernels
# --------------------------------------------------------------------------
def _softmax_lane_kernel(x_ref, o_ref):
    # Softmax over the last (lane) dim of a (tile_rows, cols) block.
    x_src = x_ref[...]
    m = jnp.max(x_src, axis=-1, keepdims=True).astype(jnp.float32)  # reduce in src dtype
    x = x_src.astype(jnp.float32)
    e = jnp.exp(x - m)
    s = jnp.sum(e, axis=-1, keepdims=True)
    o_ref[...] = (e * _precise_reciprocal(s)).astype(o_ref.dtype)


def _softmax_sublane_kernel(x_ref, o_ref):
    # Softmax over the sublane (second-to-last) dim of a (tile_b, C, tile_l)
    # block; the last dim stays lane-dense (unmasked wide stores).
    x_src = x_ref[...]
    m = jnp.max(x_src, axis=-2, keepdims=True).astype(jnp.float32)
    x = x_src.astype(jnp.float32)
    e = jnp.exp(x - m)
    s = jnp.sum(e, axis=-2, keepdims=True)
    o_ref[...] = (e * _precise_reciprocal(s)).astype(o_ref.dtype)


def _softmax_stats_kernel(cols_total, needs_mask, x_ref, m_ref, r_ref):
    # Pass 1 of the streamed path: running max / running sum over column
    # chunks (grid axis 1, 'arbitrary'); finalize stores 1/sum in r_ref.
    j = pl.program_id(1)

    @pl.when(j == 0)
    def _():
        m_ref[...] = jnp.full(m_ref.shape, -jnp.inf, m_ref.dtype)
        r_ref[...] = jnp.zeros(r_ref.shape, r_ref.dtype)

    x = x_ref[...].astype(jnp.float32)
    if needs_mask:
        # Padding columns of the last chunk hold garbage; mask them so they
        # cannot contaminate valid rows' max/sum.
        tile_cols = x.shape[-1]
        col_idx = j * tile_cols + lax.broadcasted_iota(jnp.int32, x.shape, 1)
        x = jnp.where(col_idx < cols_total, x, -jnp.inf)

    m_prev = m_ref[...]
    m_new = jnp.maximum(m_prev, jnp.max(x, axis=-1, keepdims=True))
    r_ref[...] = r_ref[...] * jnp.exp(m_prev - m_new) + jnp.sum(
        jnp.exp(x - m_new), axis=-1, keepdims=True)
    m_ref[...] = m_new

    @pl.when(j == pl.num_programs(1) - 1)
    def _():
        r_ref[...] = _precise_reciprocal(r_ref[...])


def _softmax_apply_kernel(x_ref, m_ref, r_ref, o_ref):
    # Pass 2 of the streamed path: normalize and store (fully parallel grid).
    x = x_ref[...].astype(jnp.float32)
    o_ref[...] = (jnp.exp(x - m_ref[...]) * r_ref[...]).astype(o_ref.dtype)


# --------------------------------------------------------------------------
# pallas_call wrappers
# --------------------------------------------------------------------------
def _softmax_lane(x2d):
    """Row-wise softmax over the last dim of a 2D array (single block per
    row). Returns None if a row's working set does not fit one VMEM block."""
    rows, cols = x2d.shape
    dtype = x2d.dtype
    itemsize = jnp.dtype(dtype).itemsize
    unit = _sublane_unit(dtype)

    cols_pad = _round_up(cols, _LANE)                      # lane padding in VMEM
    per_row_ws = cols_pad * _bytes_per_elem_working_set(dtype)
    rows_ws = _round_down(_TILE_BUDGET_BYTES // per_row_ws, unit)
    if rows_ws < unit:
        return None  # cols too large for one block; caller uses streamed path

    rows_tgt = max(unit, _round_down(
        _TARGET_TILE_BYTES // max(1, cols * itemsize), unit))
    tile_rows = min(rows_ws, rows_tgt)

    # Guarantee a multi-step grid (pipeline overlap + v7x megacore) once the
    # tensor is large enough to amortize the per-step overhead.
    total_bytes = rows * cols * itemsize
    if total_bytes >= _MIN_SPLIT_BYTES and rows >= 2 * unit:
        tile_rows = min(tile_rows, _round_up(_cdiv(rows, 2), unit))
    tile_rows = min(tile_rows, _round_up(rows, unit))

    grid = (pl.cdiv(rows, tile_rows),)
    return pl.pallas_call(
        _softmax_lane_kernel,
        out_shape=jax.ShapeDtypeStruct((rows, cols), dtype),
        grid_spec=pltpu.PrefetchScalarGridSpec(
            num_scalar_prefetch=0,
            grid=grid,
            in_specs=[pl.BlockSpec((tile_rows, cols), lambda i: (i, 0))],
            out_specs=pl.BlockSpec((tile_rows, cols), lambda i: (i, 0)),
        ),
        compiler_params=pltpu.CompilerParams(
            dimension_semantics=("parallel",),
            vmem_limit_bytes=_VMEM_LIMIT_BYTES,
        ),
        cost_estimate=_cost_estimate(rows * cols, itemsize),
    )(x2d)


def _softmax_lane_streamed(x2d, max_tile_cols=None):
    """Streamed last-dim softmax for arbitrarily large feature dims:
    pass 1 accumulates running max / sum (column axis 'arbitrary'),
    pass 2 normalizes. ~2 HBM reads + 1 write total."""
    rows, cols = x2d.shape
    dtype = x2d.dtype
    itemsize = jnp.dtype(dtype).itemsize
    unit = _sublane_unit(dtype)
    ws = _bytes_per_elem_working_set(dtype)

    tile_rows = min(_round_up(rows, unit), 8 * unit)
    max_cols_ws = _round_down(_TILE_BUDGET_BYTES // (tile_rows * ws), _LANE)
    tgt_cols = _round_down(
        max(_TARGET_TILE_BYTES // (tile_rows * itemsize), _LANE), _LANE)
    tile_cols = max(_LANE, min(max_cols_ws, tgt_cols, _round_up(cols, _LANE)))
    if max_tile_cols is not None:  # used by tests to force multi-chunk streaming
        tile_cols = max(_LANE, min(tile_cols, _round_down(max_tile_cols, _LANE)))

    grid = (pl.cdiv(rows, tile_rows), pl.cdiv(cols, tile_cols))
    needs_mask = (cols % tile_cols) != 0

    m, r = pl.pallas_call(
        functools.partial(_softmax_stats_kernel, cols, needs_mask),
        out_shape=(jax.ShapeDtypeStruct((rows, 1), jnp.float32),
                   jax.ShapeDtypeStruct((rows, 1), jnp.float32)),
        grid_spec=pltpu.PrefetchScalarGridSpec(
            num_scalar_prefetch=0,
            grid=grid,
            in_specs=[pl.BlockSpec((tile_rows, tile_cols), lambda i, j: (i, j))],
            out_specs=[pl.BlockSpec((tile_rows, 1), lambda i, j: (i, 0)),
                       pl.BlockSpec((tile_rows, 1), lambda i, j: (i, 0))],
        ),
        compiler_params=pltpu.CompilerParams(
            dimension_semantics=("parallel", "arbitrary"),
            vmem_limit_bytes=_VMEM_LIMIT_BYTES,
        ),
        cost_estimate=pl.CostEstimate(
            flops=4 * rows * cols, transcendentals=rows * cols,
            bytes_accessed=rows * cols * itemsize + 8 * rows),
    )(x2d)

    return pl.pallas_call(
        _softmax_apply_kernel,
        out_shape=jax.ShapeDtypeStruct((rows, cols), dtype),
        grid_spec=pltpu.PrefetchScalarGridSpec(
            num_scalar_prefetch=0,
            grid=grid,
            in_specs=[pl.BlockSpec((tile_rows, tile_cols), lambda i, j: (i, j)),
                      pl.BlockSpec((tile_rows, 1), lambda i, j: (i, 0)),
                      pl.BlockSpec((tile_rows, 1), lambda i, j: (i, 0))],
            out_specs=pl.BlockSpec((tile_rows, tile_cols), lambda i, j: (i, j)),
        ),
        compiler_params=pltpu.CompilerParams(
            dimension_semantics=("parallel", "parallel"),
            vmem_limit_bytes=_VMEM_LIMIT_BYTES,
        ),
        cost_estimate=pl.CostEstimate(
            flops=3 * rows * cols, transcendentals=rows * cols,
            bytes_accessed=2 * rows * cols * itemsize + 8 * rows),
    )(x2d, m, r)


def _softmax_sublane(x3d):
    """Softmax over axis 1 of a (B, C, L) array, keeping L lane-dense.
    Returns None if C is too large to hold resident in a block."""
    B, C, L = x3d.shape
    dtype = x3d.dtype
    itemsize = jnp.dtype(dtype).itemsize
    unit = _sublane_unit(dtype)

    # Account for physical sublane padding of C (in/out tiles in src dtype,
    # f32 temporaries pad to 8 sublanes).
    c_src = _round_up(C, unit)
    c_f32 = _round_up(C, 8)
    per_lane = 4 * c_src * itemsize + 3 * 4 * c_f32        # bytes per lane column
    max_lanes = _round_down(_TILE_BUDGET_BYTES // per_lane, _LANE)
    if max_lanes < _LANE:
        return None  # softmax dim too large; caller falls back to lane path
    lanes_tgt = max(_LANE, _round_down(
        _TARGET_TILE_BYTES // (c_src * itemsize), _LANE))
    max_lanes = min(max_lanes, lanes_tgt)

    if max_lanes >= L:
        tile_l = L  # full-extent lane block (legal for any L)
        L_pad = _round_up(L, _LANE)
        tile_b = max(1, min(B,
                            _TILE_BUDGET_BYTES // max(1, per_lane * L_pad),
                            _TARGET_TILE_BYTES // max(1, c_src * itemsize * L_pad)))
    else:
        tile_l = max_lanes  # multiple of 128; partial last block masked
        tile_b = 1

    # Guarantee a multi-step grid once the tensor is big enough.
    total_bytes = B * C * L * itemsize
    if total_bytes >= _MIN_SPLIT_BYTES and _cdiv(B, tile_b) * _cdiv(L, tile_l) < 2:
        if B >= 2:
            tile_b = _cdiv(B, 2)
        elif L >= 2 * _LANE:
            tile_l = min(tile_l, max(_LANE, _round_up(_cdiv(L, 2), _LANE)))

    grid = (pl.cdiv(B, tile_b), pl.cdiv(L, tile_l))
    return pl.pallas_call(
        _softmax_sublane_kernel,
        out_shape=jax.ShapeDtypeStruct((B, C, L), dtype),
        grid_spec=pltpu.PrefetchScalarGridSpec(
            num_scalar_prefetch=0,
            grid=grid,
            in_specs=[pl.BlockSpec((tile_b, C, tile_l), lambda b, l: (b, 0, l))],
            out_specs=pl.BlockSpec((tile_b, C, tile_l), lambda b, l: (b, 0, l)),
        ),
        compiler_params=pltpu.CompilerParams(
            dimension_semantics=("parallel", "parallel"),
            vmem_limit_bytes=_VMEM_LIMIT_BYTES,
        ),
        cost_estimate=_cost_estimate(B * C * L, itemsize),
    )(x3d)


# --------------------------------------------------------------------------
# Module-level softmax (torch.nn.functional.softmax semantics)
# --------------------------------------------------------------------------
def _default_softmax_dim(ndim):
    # Mirrors torch.nn.functional._get_softmax_dim.
    return 0 if ndim in (0, 1, 3) else 1


def _lane_softmax_2d(x2d):
    y = _softmax_lane(x2d)
    if y is None:
        y = _softmax_lane_streamed(x2d)
    return y


def softmax(x, dim=None, _stacklevel=3, dtype=None):
    x = jnp.asarray(x)
    if dim is None:
        dim = _default_softmax_dim(x.ndim)
    if dtype is not None:
        x = x.astype(dtype)  # torch casts the input before the op
    if x.ndim == 0:
        return jnp.ones_like(x)
    dim = dim % x.ndim
    if x.size == 0:
        return x
    if not jnp.issubdtype(x.dtype, jnp.floating):
        # torch raises for integer inputs; compute in f32 via XLA instead of
        # silently round-tripping through an int kernel.
        return jax.nn.softmax(x.astype(jnp.float32), axis=dim)

    shape = x.shape
    C = shape[dim]
    lead = math.prod(shape[:dim])
    trail = math.prod(shape[dim + 1:])

    if trail == 1:
        # Softmax axis is (effectively) innermost: lane-path kernel.
        return _lane_softmax_2d(x.reshape(lead, C)).reshape(shape)

    if trail >= _LANE:
        # Interior axis with lane-dense trailing dims (e.g. NCHW channel
        # softmax): pure reshape, no HBM transpose; reduce over sublanes.
        y3d = _softmax_sublane(x.reshape(lead, C, trail))
        if y3d is not None:
            return y3d.reshape(shape)

    # Lane-sparse trailing dims (< 128 lanes) or an over-large softmax dim:
    # move the softmax axis last so stores stay lane-dense, then lane path
    # (streamed if the feature dim is too large for one block).
    x_moved = jnp.moveaxis(x, dim, -1)
    y2d = _lane_softmax_2d(x_moved.reshape(lead * trail, C))
    return jnp.moveaxis(y2d.reshape(x_moved.shape), -1, dim)


class Softmax:
    """Stateless module matching lib/blocks/BasicBlocks.Softmax."""

    def __call__(self, input, dim=None, _stacklevel=3, dtype=None):
        return softmax(input, dim=dim, _stacklevel=_stacklevel, dtype=dtype)


if __name__ == "__main__":
    key = jax.random.PRNGKey(0)
    k1, k2 = jax.random.split(key)
    # Small NCHW input consistent with typical use of this block.
    x = jax.random.normal(k1, (2, 4, 16, 16), dtype=jnp.float32)

    mod = Softmax()

    # dim=None -> PyTorch default picks dim=1 for a 4-D tensor (channel
    # softmax); exercises the transpose-free sublane path (trail=256 lanes).
    out = jax.block_until_ready(mod(x))
    ref = jax.nn.softmax(x, axis=1)
    assert out.shape == x.shape
    assert jnp.allclose(out, ref, atol=1e-5, rtol=1e-5)
    assert jnp.allclose(out.sum(axis=1), jnp.ones((2, 16, 16)), atol=1e-5)

    # Explicit last-dim softmax exercises the lane path.
    out_last = jax.block_until_ready(mod(x, dim=-1))
    assert jnp.allclose(out_last, jax.nn.softmax(x, axis=-1), atol=1e-5, rtol=1e-5)

    # dtype kwarg / bf16 path (source-dtype max reduction, f32 accumulation).
    out_bf16 = jax.block_until_ready(mod(x, dim=1, dtype=jnp.bfloat16))
    assert out_bf16.dtype == jnp.bfloat16
    assert jnp.allclose(out_bf16.astype(jnp.float32), ref, atol=2e-2, rtol=2e-2)

    # Small trailing dim (trail < 128): dispatcher avoids the lane-sparse
    # sublane path and uses moveaxis + lane kernel (lane-dense stores).
    x_small_trail = jax.random.normal(k2, (2, 8, 4, 4), dtype=jnp.float32)
    out_st = jax.block_until_ready(mod(x_small_trail, dim=1))
    assert jnp.allclose(out_st, jax.nn.softmax(x_small_trail, axis=1),
                        atol=1e-5, rtol=1e-5)

    # Streamed (multi-column-chunk) online-softmax path, forced with a small
    # per-tile column cap so the running max/sum accumulation and boundary
    # masking are exercised at a small shape.
    x_wide = jax.random.normal(key, (8, 4000), dtype=jnp.float32)
    out_wide = jax.block_until_ready(_softmax_lane_streamed(x_wide, max_tile_cols=1024))
    assert jnp.allclose(out_wide, jax.nn.softmax(x_wide, axis=-1),
                        atol=1e-5, rtol=1e-5)

    print("KERNEL_OK")
</pallas_src>

<mosaic_0001>
module attributes {stable_mosaic.version = 11 : i64} {
  func.func @_softmax_sublane_kernel(%arg0: i32, %arg1: i32, %arg2: memref<2x4x256xf32, #tpu.memory_space<vmem>>, %arg3: memref<2x4x256xf32, #tpu.memory_space<vmem>>) attributes {dimension_semantics = [#tpu.dimension_semantics<parallel>, #tpu.dimension_semantics<parallel>], iteration_bounds = array<i64: 1, 1>, scalar_prefetch = 0 : i64, scratch_operands = 0 : i64, tpu.core_type = #tpu.core_type<tc>, window_params = [{transform_indices = @transform_0, window_bounds = array<i64: 2, 4, 256>}, {transform_indices = @transform_1, window_bounds = array<i64: 2, 4, 256>}]} {
    %c0 = arith.constant 0 : index
    %c0_0 = arith.constant 0 : index
    %c0_1 = arith.constant 0 : index
    %0 = vector.load %arg2[%c0, %c0_0, %c0_1] : memref<2x4x256xf32, #tpu.memory_space<vmem>>, vector<2x4x256xf32>
    %cst = arith.constant dense<0xFF800000> : vector<2x256xf32>
    %1 = vector.multi_reduction <maximumf>, %0, %cst [1] : vector<2x4x256xf32> to vector<2x256xf32>
    %2 = vector.shape_cast %1 : vector<2x256xf32> to vector<2x1x256xf32>
    %3 = vector.broadcast %2 : vector<2x1x256xf32> to vector<2x4x256xf32>
    %4 = arith.subf %0, %3 : vector<2x4x256xf32>
    %5 = math.exp %4 : vector<2x4x256xf32>
    %cst_2 = arith.constant dense<0.000000e+00> : vector<2x256xf32>
    %6 = vector.multi_reduction <add>, %5, %cst_2 [1] : vector<2x4x256xf32> to vector<2x256xf32>
    %7 = vector.shape_cast %6 : vector<2x256xf32> to vector<2x1x256xf32>
    %8 = tpu.reciprocal %7 {approx = true} : vector<2x1x256xf32> -> vector<2x1x256xf32>
    %9 = arith.mulf %7, %8 : vector<2x1x256xf32>
    %cst_3 = arith.constant 2.000000e+00 : f32
    %10 = vector.broadcast %cst_3 : f32 to vector<2x1x256xf32>
    %11 = arith.subf %10, %9 : vector<2x1x256xf32>
    %12 = arith.mulf %8, %11 : vector<2x1x256xf32>
    %13 = arith.mulf %7, %12 : vector<2x1x256xf32>
    %cst_4 = arith.constant 2.000000e+00 : f32
    %14 = vector.broadcast %cst_4 : f32 to vector<2x1x256xf32>
    %15 = arith.subf %14, %13 : vector<2x1x256xf32>
    %16 = arith.mulf %12, %15 : vector<2x1x256xf32>
    %17 = vector.broadcast %16 : vector<2x1x256xf32> to vector<2x4x256xf32>
    %18 = arith.mulf %5, %17 : vector<2x4x256xf32>
    %c0_5 = arith.constant 0 : index
    %c0_6 = arith.constant 0 : index
    %c0_7 = arith.constant 0 : index
    %19 = vector.load %arg3[%c0_5, %c0_6, %c0_7] : memref<2x4x256xf32, #tpu.memory_space<vmem>>, vector<2x4x256xf32>
    tpu.vector_store %arg3[%c0_5, %c0_6, %c0_7], %18 {strides = array<i32>} : memref<2x4x256xf32, #tpu.memory_space<vmem>>, vector<2x4x256xf32>,
    return
  }
  func.func @transform_0(%arg0: i32, %arg1: i32) -> (i32, i32, i32) {
    %c0_i32 = arith.constant 0 : i32
    %c0_i32_0 = arith.constant 0 : i32
    return %arg0, %c0_i32, %arg1 : i32, i32, i32
  }
  func.func @transform_1(%arg0: i32, %arg1: i32) -> (i32, i32, i32) {
    %c0_i32 = arith.constant 0 : i32
    %c0_i32_0 = arith.constant 0 : i32
    return %arg0, %c0_i32, %arg1 : i32, i32, i32
  }
}

</mosaic_0001>

<bundles_post_ra>
// kernel: tpu_custom_call.1
= control target key start
LH: loop header
LB: loop body
LE: loop exit
PB: predicated region body
PF: predicated region fallthrough
CT: control target
= control target key end

     0   :  { %6 = vsyncpa [#allocation3], 0  ;;  %s295_s0 = inlined_call_operand.hbm [shape: f32[2,4,256], index: 0, kind: input, shape index: {}]   ;;  %s296_s1 = inlined_call_operand.hbm [shape: f32[2,4,256], index: 1, kind: output, shape index: {}]  }
   0x1   :  { %7 = vsyncpa [#allocation4], 0  ;;  %s231_s6 = smov [#allocation2]   ;;  %s183_s10 = scalar_lea.hbm %s295_s0, 256 }
   0x2   :  { %s13_s7 = sshll.u32 %s231_s6, 4  ;;  %p184_p0 = scmp.ne.s32.totalorder %s295_s0, %s183_s10  ;;  %s14_s7 = int_to_ptr.vmem [resolvable:$true] %s13_s7 }
   0x3   :  { %p187_p1 = scmp.lt.u32.totalorder %s183_s10, %s295_s0 }
   0x5   :  { %p189_p2 = pnand %p187_p1, %p184_p0 }
   0x7   :  { %192 = shalt.err (!%p189_p2)
}
   0x8   :  { %s193_s15 = scalar_lea.vmem %s14_s7, 256  ;;  %p198_p4 = scmp.lt.s32.totalorder %s14_s7, %s14_s7 }
   0x9   :  { %p194_p3 = scmp.ne.s32.totalorder %s14_s7, %s193_s15  ;;  %p199_p5 = scmp.lt.s32.totalorder %s193_s15, %s193_s15 }
   0xb   :  { %p200_p6 = por %p199_p5, %p198_p4 }
   0xd   :  { %p201_p7 = pnand %p200_p6, %p194_p3 }
   0xf   :  { %204 = shalt.err (!%p201_p7)
}
  0x10   :  { %s232_s16 = smov 128   ;;  %s233_s17 = smov 8  }
  0x11   :  { %19 = dma.hbm_to_vmem [thread:$0]  %s295_s0, 256, %s14_s7, [#allocation3], %s232_s16, %s232_s16, %s233_s17  }
  0x12   :  { %227 = dma.done.wait [#allocation3], 256  }
  0x13   :  { %228 = vsyncadd [#allocation3], 4294967040  ;;  %vm31_vm0 = vcmask 1043456   ;;  %v23_v0 = vld [vmem:[#allocation2] sm:$0xff]  ;;  %v24_v1 = vld [vmem:[#allocation2 + $0x8] sm:$0xff]  ;;  %s234_s0 = smov [#allocation5]  }
  0x14   :  { %v27_v2 = vcombine.high %v23_v0, %v23_v0  ;;  %v32_v3 = vsel %vm31_vm0, %v23_v0, -inf  ;;  %v28_v4 = vcombine.high %v24_v1, %v24_v1  ;;  %v46_v5 = vsel %vm31_vm0, %v24_v1, -inf  ;;  %s153_s20 = sshll.u32 %s234_s0, 4  ;;  %s154_s20 = int_to_ptr.vmem [resolvable:$true] %s153_s20 }
  0x15   :  { %v33_v6 = vrot.slane %v32_v3, 4  ;;  %v47_v7 = vrot.slane %v46_v5, 4  ;;  %s205_s21 = scalar_lea.vmem %s154_s20, 256  ;;  %p210_p9 = scmp.lt.s32.totalorder %s154_s20, %s154_s20 }
  0x16   :  { %v39_v8 = vsel %vm31_vm0, %v27_v2, -inf  ;;  %v53_v9 = vsel %vm31_vm0, %v28_v4, -inf  ;;  %p206_p8 = scmp.ne.s32.totalorder %s154_s20, %s205_s21  ;;  %p211_p10 = scmp.lt.s32.totalorder %s205_s21, %s205_s21 }
  0x17   :  { %v34_v10 = vmax.f32 %v32_v3, %v33_v6  ;;  %v40_v11 = vrot.slane %v39_v8, 4  ;;  %v48_v12 = vmax.f32 %v46_v5, %v47_v7  ;;  %v54_v13 = vrot.slane %v53_v9, 4 }
  0x18   :  { %p212_p11 = por %p211_p10, %p210_p9 }
  0x19   :  { %v35_v14 = vrot.slane %v34_v10, 2  ;;  %v41_v15 = vmax.f32 %v39_v8, %v40_v11  ;;  %v49_v16 = vrot.slane %v48_v12, 2  ;;  %v55_v17 = vmax.f32 %v53_v9, %v54_v13 }
  0x1a   :  { %p213_p12 = pnand %p212_p11, %p206_p8 }
  0x1b   :  { %v36_v18 = vmax.f32 %v34_v10, %v35_v14  ;;  %v42_v19 = vrot.slane %v41_v15, 2  ;;  %v50_v20 = vmax.f32 %v48_v12, %v49_v16  ;;  %v56_v21 = vrot.slane %v55_v17, 2 }
  0x1d   :  { %v37_v22 = vrot.slane %v36_v18, 1  ;;  %v43_v23 = vmax.f32 %v41_v15, %v42_v19  ;;  %v51_v24 = vrot.slane %v50_v20, 1  ;;  %v57_v25 = vmax.f32 %v55_v17, %v56_v21 }
  0x1f   :  { %v38_v26 = vmax.f32 %v36_v18, %v37_v22  ;;  %v44_v27 = vrot.slane %v43_v23, 1  ;;  %v52_v28 = vmax.f32 %v50_v20, %v51_v24  ;;  %v58_v29 = vrot.slane %v57_v25, 1 }
  0x21   :  { %v45_v30 = vmax.f32 %v43_v23, %v44_v27  ;;  %v59_v31 = vmax.f32 %v57_v25, %v58_v29 }
  0x23   :  { %v64_v32 = vcombine.low %v38_v26, %v45_v30  ;;  %v65_v33 = vcombine.low %v52_v28, %v59_v31 }
  0x25   :  { %v68_v34 = vsub.f32 %v23_v0, %v64_v32  ;;  %v69_v35 = vsub.f32 %v24_v1, %v65_v33 }
  0x27   :  { %v70_v36 = vmul.f32 1.442695, %v68_v34  ;;  %v72_v37 = vmul.f32 1.442695, %v69_v35 }
  0x29   :  { %171 = vpow2.f32 %v70_v36 }
  0x2a   :  { %173 = vpow2.f32 %v72_v37 }
  0x33   :  { %v264_v38 = vpop.eup %171 }
  0x34   :  { %v266_v39 = vpop.eup %173  ;;  %v76_v40 = vcombine.high %v264_v38, %v264_v38  ;;  %v80_v41 = vsel %vm31_vm0, %v264_v38, 0.0 }
  0x35   :  { %v81_v42 = vrot.slane %v80_v41, 4  ;;  %v77_v43 = vcombine.high %v266_v39, %v266_v39  ;;  %v94_v44 = vsel %vm31_vm0, %v266_v39, 0.0 }
  0x36   :  { %v87_v45 = vsel %vm31_vm0, %v76_v40, 0.0  ;;  %v95_v46 = vrot.slane %v94_v44, 4 }
  0x37   :  { %v82_v47 = vadd.f32 %v81_v42, %v80_v41  ;;  %v88_v48 = vrot.slane %v87_v45, 4  ;;  %v101_v49 = vsel %vm31_vm0, %v77_v43, 0.0 }
  0x38   :  { %v96_v50 = vadd.f32 %v95_v46, %v94_v44  ;;  %v102_v51 = vrot.slane %v101_v49, 4 }
  0x39   :  { %v83_v52 = vrot.slane %v82_v47, 2  ;;  %v89_v53 = vadd.f32 %v88_v48, %v87_v45 }
  0x3a   :  { %v97_v54 = vrot.slane %v96_v50, 2  ;;  %v103_v55 = vadd.f32 %v102_v51, %v101_v49 }
  0x3b   :  { %v84_v56 = vadd.f32 %v83_v52, %v82_v47  ;;  %v90_v57 = vrot.slane %v89_v53, 2 }
  0x3c   :  { %v98_v58 = vadd.f32 %v97_v54, %v96_v50  ;;  %v104_v59 = vrot.slane %v103_v55, 2 }
  0x3d   :  { %v85_v60 = vrot.slane %v84_v56, 1  ;;  %v91_v61 = vadd.f32 %v90_v57, %v89_v53 }
  0x3e   :  { %v99_v62 = vrot.slane %v98_v58, 1  ;;  %v105_v63 = vadd.f32 %v104_v59, %v103_v55 }
  0x3f   :  { %v86_v0 = vadd.f32 %v85_v60, %v84_v56  ;;  %v92_v1 = vrot.slane %v91_v61, 1 }
  0x40   :  { %v100_v2 = vadd.f32 %v99_v62, %v98_v58  ;;  %v106_v3 = vrot.slane %v105_v63, 1 }
  0x41   :  { %v93_v4 = vadd.f32 %v92_v1, %v91_v61  ;;  %175 = vrcp.f32 %v86_v0 }
  0x42   :  { %v107_v5 = vadd.f32 %v106_v3, %v105_v63  ;;  %177 = vrcp.f32 %v100_v2 }
  0x43   :  { %179 = vrcp.f32 %v93_v4 }
  0x44   :  { %181 = vrcp.f32 %v107_v5 }
  0x4b   :  { %v176_v6 = vpop.eup %175 }
  0x4c   :  { %v178_v7 = vpop.eup %177  ;;  %v112_v8 = vmul.f32 %v176_v6, %v86_v0 }
  0x4d   :  { %v180_v9 = vpop.eup %179  ;;  %v114_v10 = vmul.f32 %v178_v7, %v100_v2 }
  0x4e   :  { %v182_v11 = vpop.eup %181  ;;  %v113_v12 = vmul.f32 %v180_v9, %v93_v4  ;;  %v116_v13 = vsub.f32 2.0, %v112_v8 }
  0x4f   :  { %v115_v14 = vmul.f32 %v182_v11, %v107_v5  ;;  %v118_v15 = vsub.f32 2.0, %v114_v10 }
  0x50   :  { %v117_v16 = vsub.f32 2.0, %v113_v12  ;;  %v120_v17 = vmul.f32 %v176_v6, %v116_v13 }
  0x51   :  { %v119_v18 = vsub.f32 2.0, %v115_v14  ;;  %v122_v19 = vmul.f32 %v178_v7, %v118_v15 }
  0x52   :  { %v121_v20 = vmul.f32 %v180_v9, %v117_v16  ;;  %v124_v21 = vmul.f32 %v120_v17, %v86_v0 }
  0x53   :  { %v123_v22 = vmul.f32 %v182_v11, %v119_v18  ;;  %v126_v23 = vmul.f32 %v122_v19, %v100_v2 }
  0x54   :  { %v125_v24 = vmul.f32 %v121_v20, %v93_v4  ;;  %v128_v25 = vsub.f32 2.0, %v124_v21 }
  0x55   :  { %v127_v26 = vmul.f32 %v123_v22, %v107_v5  ;;  %v130_v27 = vsub.f32 2.0, %v126_v23 }
  0x56   :  { %v129_v28 = vsub.f32 2.0, %v125_v24  ;;  %v132_v29 = vmul.f32 %v128_v25, %v120_v17 }
  0x57   :  { %v131_v30 = vsub.f32 2.0, %v127_v26  ;;  %v134_v31 = vmul.f32 %v130_v27, %v122_v19 }
  0x58   :  { %v133_v32 = vmul.f32 %v129_v28, %v121_v20 }
  0x59   :  { %v135_v33 = vmul.f32 %v131_v30, %v123_v22 }
  0x5a   :  { %v140_v34 = vcombine.low %v132_v29, %v133_v32 }
  0x5b   :  { %v141_v35 = vcombine.low %v134_v31, %v135_v33 }
  0x5c   :  { %v144_v36 = vmul.f32 %v264_v38, %v140_v34 }
  0x5d   :  { %v145_v37 = vmul.f32 %v266_v39, %v141_v35 }
  0x5e   :  { %146 = vst [vmem:[#allocation5] sm:$0xff] %v144_v36 }
  0x5f   :  { %147 = vst [vmem:[#allocation5 + $0x8] sm:$0xff] %v145_v37 }
  0x60   :  { %216 = shalt.err (!%p213_p12)
}
  0x61   :  { %s217_s24 = scalar_lea.hbm %s296_s1, 256 }
  0x62   :  { %p218_p13 = scmp.ne.s32.totalorder %s296_s1, %s217_s24  ;;  %p221_p0 = scmp.lt.u32.totalorder %s217_s24, %s296_s1 }
  0x64   :  { %p223_p1 = pnand %p221_p0, %p218_p13 }
  0x66   :  { %226 = shalt.err (!%p223_p1)
}
  0x67   :  { %159 = dma.vmem_to_hbm [thread:$0]  %s154_s20, 256, %s296_s1, [#allocation4], %s232_s16, %s232_s16, %s233_s17  }
  0x68   :  { %229 = dma.done.wait [#allocation4], 256  }
  0x69   :  { %230 = vsyncadd [#allocation4], 4294967040 }
  0x6a   :  { %163 = vsyncpa [#allocation3], 1 }
  0x6b   :  { %164 = vsyncpa [#allocation4], 1 }

</bundles_post_ra>
